<compile_context>
chip_gen: v7x
topology: tpu7x:2x2x1
jax: 0.10.0
libtpu: 0.0.40
codegen_flags: <defaults>
</compile_context>

<pallas_src>
import math

import jax
import jax.numpy as jnp
from jax.experimental import pallas as pl
from jax.experimental.pallas import tpu as pltpu


# Total per-step tile working set (all operands, double-buffered) kept under this budget so the
# kernel compiles with default scoped-VMEM limits on every TPU generation (v5e's 16 MiB is the
# tightest; v7x has only 64 MiB physical VMEM).
_VMEM_TILE_BUDGET_BYTES = 12 * 1024 * 1024


def make_positional_encoding(d_model: int, max_len: int = 5000,
                             dtype=jnp.float32) -> jnp.ndarray:
    """Deterministic sinusoidal table, identical to the PyTorch __init__ buffer.

    Returns pe of shape (1, max_len, d_model).
    """
    position = jnp.arange(0, max_len, dtype=jnp.float32)[:, None]            # (max_len, 1)
    div_term = jnp.exp(
        jnp.arange(0, d_model, 2, dtype=jnp.float32) * (-math.log(10000.0) / d_model)
    )                                                                         # (d_model//2,)
    angles = position * div_term                                              # (max_len, d_model//2)
    pe = jnp.zeros((max_len, d_model), dtype=jnp.float32)
    pe = pe.at[:, 0::2].set(jnp.sin(angles))
    pe = pe.at[:, 1::2].set(jnp.cos(angles))
    return pe[None, :, :].astype(dtype)                                       # (1, max_len, d_model)


def _add_pe_kernel(x_ref, pe_ref, o_ref):
    # Pure elementwise add; pe block broadcasts over the batch dim of the x block when needed.
    o_ref[...] = (x_ref[...] + pe_ref[...]).astype(o_ref.dtype)


def _sublane(itemsize: int) -> int:
    # f32 -> 8, bf16 -> 16, int8/fp8 -> 32 minimum sublane tile.
    return max(8, 32 // itemsize)


def _forward_lane_dense(x, pe_slice):
    """D is a multiple of 128: tile the sequence axis, keep full D as the lane axis."""
    B, S, D = x.shape
    itemsize = jnp.dtype(x.dtype).itemsize
    sub = _sublane(itemsize)

    if S <= sub:
        TS = S                                   # full dim is always a legal block extent
    else:
        # 3 operands (x, pe, out), double-buffered: 6 * TS * D * itemsize bytes.
        ts_max = max(sub, _VMEM_TILE_BUDGET_BYTES // (6 * D * itemsize))
        TS = min(S, ts_max)
        TS = max(sub, (TS // sub) * sub)         # multiple of the sublane tile
        if TS >= S:
            TS = S
    num_s = pl.cdiv(S, TS)

    return pl.pallas_call(
        _add_pe_kernel,
        out_shape=jax.ShapeDtypeStruct((B, S, D), x.dtype),
        grid_spec=pltpu.PrefetchScalarGridSpec(
            num_scalar_prefetch=0,
            # Batch is the INNER grid axis: the pe block index (0, s, 0) is constant across it,
            # so pe is DMA'd once per sequence tile instead of once per (s, b) step.
            grid=(num_s, B),
            in_specs=[
                pl.BlockSpec((1, TS, D), lambda s, b: (b, s, 0)),   # x
                pl.BlockSpec((1, TS, D), lambda s, b: (0, s, 0)),   # pe (reused across b)
            ],
            out_specs=pl.BlockSpec((1, TS, D), lambda s, b: (b, s, 0)),
        ),
        compiler_params=pltpu.CompilerParams(
            # S-tiles parallel (lets v7x's two TensorCores split the HBM stream evenly even
            # for tiny batch); batch inner axis arbitrary to preserve pe reuse ordering.
            dimension_semantics=("parallel", "arbitrary"),
        ),
    )(x, pe_slice)


def _forward_flat(x, pe_slice):
    """Small / non-128-multiple d_model: flatten (S, D) into one lane-dense axis."""
    B, S, D = x.shape
    flat = S * D
    itemsize = jnp.dtype(x.dtype).itemsize

    x2 = x.reshape(B, flat)
    pe2 = pe_slice.reshape(1, flat)

    if flat <= 128:
        TF = flat
    else:
        # Per step: x (B,TF) + out (B,TF) + pe (1,TF), double-buffered.
        tf_max = max(128, _VMEM_TILE_BUDGET_BYTES // (2 * (2 * B + 1) * itemsize))
        TF = min(flat, tf_max)
        TF = max(128, (TF // 128) * 128)
        if TF >= flat:
            TF = flat
    num_f = pl.cdiv(flat, TF)

    out2 = pl.pallas_call(
        _add_pe_kernel,
        out_shape=jax.ShapeDtypeStruct((B, flat), x.dtype),
        grid_spec=pltpu.PrefetchScalarGridSpec(
            num_scalar_prefetch=0,
            grid=(num_f,),
            in_specs=[
                pl.BlockSpec((B, TF), lambda f: (0, f)),   # x (full batch per block)
                pl.BlockSpec((1, TF), lambda f: (0, f)),   # pe (broadcast over batch in-kernel)
            ],
            out_specs=pl.BlockSpec((B, TF), lambda f: (0, f)),
        ),
        compiler_params=pltpu.CompilerParams(
            dimension_semantics=("parallel",),
        ),
    )(x2, pe2)
    return out2.reshape(B, S, D)


def positional_encoding_forward(x: jnp.ndarray, pe: jnp.ndarray) -> jnp.ndarray:
    """x: (B, S, D); pe: (1, max_len, D) -> (B, S, D) in x.dtype."""
    B, S, D = x.shape
    if S > pe.shape[1]:
        raise ValueError(f"seq_len {S} exceeds positional-encoding max_len {pe.shape[1]}")
    if D != pe.shape[2]:
        raise ValueError(f"d_model mismatch: x has {D}, pe has {pe.shape[2]}")

    # Static slice of the buffer (like self.pe[:, :x.size(1), :]) + one-time cast to x's dtype
    # so the kernel streams matched-dtype operands (bf16 pe when the model runs bf16).
    pe_slice = pe[:, :S, :].astype(x.dtype)

    # TODO(synk): in a full model, prefer letting XLA fuse this add into the adjacent embedding /
    # projection op instead of a standalone kernel — that removes one full HBM round trip of x.
    if D % 128 == 0:
        return _forward_lane_dense(x, pe_slice)
    return _forward_flat(x, pe_slice)


if __name__ == "__main__":
    # Case 1: small shapes matching the module's forward (exercises the flattened lane-dense path).
    B, S, D = 2, 8, 32
    MAX_LEN = 64
    key = jax.random.PRNGKey(0)
    x = jax.random.normal(key, (B, S, D), dtype=jnp.float32)
    pe = make_positional_encoding(D, MAX_LEN)
    out = jax.block_until_ready(positional_encoding_forward(x, pe))
    ref = x + pe[:, :S, :].astype(x.dtype)
    assert out.shape == (B, S, D)
    assert jnp.allclose(out, ref, atol=1e-6), "mismatch vs reference (flat path)"

    # Case 2: d_model multiple of 128 (exercises the sequence-tiled lane-dense path).
    B2, S2, D2 = 2, 64, 128
    x2 = jax.random.normal(jax.random.PRNGKey(1), (B2, S2, D2), dtype=jnp.float32)
    pe2 = make_positional_encoding(D2, 128)
    out2 = jax.block_until_ready(positional_encoding_forward(x2, pe2))
    ref2 = x2 + pe2[:, :S2, :].astype(x2.dtype)
    assert out2.shape == (B2, S2, D2)
    assert jnp.allclose(out2, ref2, atol=1e-6), "mismatch vs reference (tiled path)"

    print("KERNEL_OK")
</pallas_src>

<mosaic_0001>
module attributes {stable_mosaic.version = 11 : i64} {
  func.func @_add_pe_kernel(%arg0: i32, %arg1: memref<2x256xf32, #tpu.memory_space<vmem>>, %arg2: memref<1x256xf32, #tpu.memory_space<vmem>>, %arg3: memref<2x256xf32, #tpu.memory_space<vmem>>) attributes {dimension_semantics = [#tpu.dimension_semantics<parallel>], iteration_bounds = array<i64: 1>, scalar_prefetch = 0 : i64, scratch_operands = 0 : i64, tpu.core_type = #tpu.core_type<tc>, window_params = [{transform_indices = @transform_0, window_bounds = array<i64: 2, 256>}, {transform_indices = @transform_1, window_bounds = array<i64: 1, 256>}, {transform_indices = @transform_2, window_bounds = array<i64: 2, 256>}]} {
    %c0 = arith.constant 0 : index
    %c0_0 = arith.constant 0 : index
    %0 = vector.load %arg1[%c0, %c0_0] : memref<2x256xf32, #tpu.memory_space<vmem>>, vector<2x256xf32>
    %c0_1 = arith.constant 0 : index
    %c0_2 = arith.constant 0 : index
    %1 = vector.load %arg2[%c0_1, %c0_2] : memref<1x256xf32, #tpu.memory_space<vmem>>, vector<1x256xf32>
    %2 = vector.broadcast %1 : vector<1x256xf32> to vector<2x256xf32>
    %3 = arith.addf %0, %2 : vector<2x256xf32>
    %c0_3 = arith.constant 0 : index
    %c0_4 = arith.constant 0 : index
    %4 = vector.load %arg3[%c0_3, %c0_4] : memref<2x256xf32, #tpu.memory_space<vmem>>, vector<2x256xf32>
    tpu.vector_store %arg3[%c0_3, %c0_4], %3 {strides = array<i32>} : memref<2x256xf32, #tpu.memory_space<vmem>>, vector<2x256xf32>,
    return
  }
  func.func @transform_0(%arg0: i32) -> (i32, i32) {
    %c0_i32 = arith.constant 0 : i32
    %c0_i32_0 = arith.constant 0 : i32
    return %c0_i32, %arg0 : i32, i32
  }
  func.func @transform_1(%arg0: i32) -> (i32, i32) {
    %c0_i32 = arith.constant 0 : i32
    %c0_i32_0 = arith.constant 0 : i32
    return %c0_i32, %arg0 : i32, i32
  }
  func.func @transform_2(%arg0: i32) -> (i32, i32) {
    %c0_i32 = arith.constant 0 : i32
    %c0_i32_0 = arith.constant 0 : i32
    return %c0_i32, %arg0 : i32, i32
  }
}

</mosaic_0001>

<bundles_post_ra>
// kernel: tpu_custom_call.1
= control target key start
LH: loop header
LB: loop body
LE: loop exit
PB: predicated region body
PF: predicated region fallthrough
CT: control target
= control target key end

     0   :  { %7 = vsyncpa [#allocation3], 0  ;;  %s157_s0 = inlined_call_operand.hbm [shape: f32[2,256], index: 0, kind: input, shape index: {}]   ;;  %s158_s1 = inlined_call_operand.vmem [shape: f32[1,256], index: 1, kind: input, shape index: {}]   ;;  %s159_s2 = inlined_call_operand.hbm [shape: f32[2,256], index: 2, kind: output, shape index: {}]  }
   0x1   :  { %8 = vsyncpa [#allocation4], 0  ;;  %s112_s9 = smov [#allocation2]   ;;  %s64_s13 = scalar_lea.hbm %s157_s0, 64 }
   0x2   :  { %s15_s10 = sshll.u32 %s112_s9, 4  ;;  %p65_p0 = scmp.ne.s32.totalorder %s157_s0, %s64_s13  ;;  %s16_s10 = int_to_ptr.vmem [resolvable:$true] %s15_s10 }
   0x3   :  { %p68_p1 = scmp.lt.u32.totalorder %s64_s13, %s157_s0 }
   0x5   :  { %p70_p2 = pnand %p68_p1, %p65_p0 }
   0x7   :  { %73 = shalt.err (!%p70_p2)
}
   0x8   :  { %s74_s18 = scalar_lea.vmem %s16_s10, 64  ;;  %p79_p4 = scmp.lt.s32.totalorder %s16_s10, %s16_s10 }
   0x9   :  { %p75_p3 = scmp.ne.s32.totalorder %s16_s10, %s74_s18  ;;  %p80_p5 = scmp.lt.s32.totalorder %s74_s18, %s74_s18 }
   0xb   :  { %p81_p6 = por %p80_p5, %p79_p4 }
   0xd   :  { %p82_p7 = pnand %p81_p6, %p75_p3 }
   0xf   :  { %85 = shalt.err (!%p82_p7)
}
  0x10   :  { %18 = dma.hbm_to_vmem [thread:$0]  %s157_s0, 64, %s16_s10, [#allocation3]  }
  0x11   :  { %108 = dma.done.wait [#allocation3], 64  }
  0x12   :  { %109 = vsyncadd [#allocation3], 4294967232  ;;  %v27_v0 = vlaneseq  ;;  %v113_v1 = vmov 1983009808   ;;  %v25_v7 = vld [vmem:[%s158_s1] sm:$0x3] }
  0x13   :  { %v37_v2 = vunpack.c.l.s4 %v113_v1  ;;  %v24_v12 = vld [vmem:[#allocation2] sm:$0xf]  ;;  %s114_s23 = smov [#allocation5]  }
  0x14   :  { %v28_v3 = vshrl.u32 %v27_v0, 7  ;;  %s52_s0 = sshll.u32 %s114_s23, 4  ;;  %s53_s0 = int_to_ptr.vmem [resolvable:$true] %s52_s0 }
  0x15   :  { %v38_v6 = vunpack.c.0.s8 %v37_v2  ;;  %s86_s24 = scalar_lea.vmem %s53_s0, 64  ;;  %p91_p9 = scmp.lt.s32.totalorder %s53_s0, %s53_s0 }
  0x16   :  { %v29_v4 = vsub.s32 0, %v28_v3  ;;  %v33_v5 = vsub.s32 1, %v28_v3  ;;  %p87_p8 = scmp.ne.s32.totalorder %s53_s0, %s86_s24  ;;  %p92_p10 = scmp.lt.s32.totalorder %s86_s24, %s86_s24 }
  0x17   :  { %v41_v10 = vsub.s32 %v38_v6, %v28_v3 }
  0x18   :  { %v30_v8 = vrot.slane %v25_v7, %v29_v4  ;;  %v34_v9 = vrot.slane %v25_v7, %v33_v5  ;;  %p93_p11 = por %p92_p10, %p91_p9 }
  0x1a   :  { %v35_v11 = vcombine.low %v30_v8, %v34_v9  ;;  %p94_p12 = pnand %p93_p11, %p87_p8 }
  0x1c   :  { %v42_v13 = vrot.slane %v35_v11, %v41_v10 }
  0x1e   :  { %v44_v14 = vadd.f32 %v42_v13, %v24_v12 }
  0x20   :  { %45 = vst [vmem:[#allocation5] sm:$0xf] %v44_v14 }
  0x21   :  { %97 = shalt.err (!%p94_p12)
}
  0x22   :  { %s98_s26 = scalar_lea.hbm %s159_s2, 64 }
  0x23   :  { %p99_p13 = scmp.ne.s32.totalorder %s159_s2, %s98_s26  ;;  %p102_p0 = scmp.lt.u32.totalorder %s98_s26, %s159_s2 }
  0x25   :  { %p104_p1 = pnand %p102_p0, %p99_p13 }
  0x27   :  { %107 = shalt.err (!%p104_p1)
}
  0x28   :  { %55 = dma.vmem_to_hbm [thread:$0]  %s53_s0, 64, %s159_s2, [#allocation4]  }
  0x29   :  { %110 = dma.done.wait [#allocation4], 64  }
  0x2a   :  { %111 = vsyncadd [#allocation4], 4294967232 }
  0x2b   :  { %59 = vsyncpa [#allocation3], 1 }
  0x2c   :  { %60 = vsyncpa [#allocation4], 1 }

</bundles_post_ra>
